<compile_context>
chip_gen: v7x
topology: tpu7x:2x2x1
jax: 0.10.0
libtpu: 0.0.40
codegen_flags: <defaults>
</compile_context>

<pallas_src>
import jax
import jax.numpy as jnp
from jax import lax
from jax.experimental import pallas as pl
from jax.experimental.pallas import tpu as pltpu

BN_EPS = 1e-5


# --------------------------------------------------------------------------
# helpers
# --------------------------------------------------------------------------
def _compiler_params():
    return pltpu.CompilerParams(
        dimension_semantics=("parallel",),
        vmem_limit_bytes=32 * 1024 * 1024,
    )


def _pick_tile(m, max_rows):
    """Largest divisor of m that is a multiple of 8 and <= max_rows."""
    best = m
    for cand in range(8, min(m, max_rows) + 1, 8):
        if m % cand == 0:
            best = cand
    return best


def _fold_bn(stats, gamma, beta, m):
    """Combine per-tile (sum, sum_sq) partials into a per-channel affine."""
    s = jnp.sum(stats.astype(jnp.float32), axis=0)          # (2, C)
    mean = s[0] / m
    var = jnp.maximum(s[1] / m - mean * mean, 0.0)
    scale = gamma.reshape(-1) * lax.rsqrt(var + BN_EPS)
    bias = beta.reshape(-1) - mean * scale
    return scale.reshape(1, -1), bias.reshape(1, -1)


# --------------------------------------------------------------------------
# stage 1: conv1 (1x1) + bn1 partial statistics
# --------------------------------------------------------------------------
def _conv1_kernel(x_ref, w1_ref, h1_ref, st_ref):
    # x_ref: (TM, Cin) bf16, w1_ref: (Cin, P) bf16
    h = jnp.dot(x_ref[...], w1_ref[...], preferred_element_type=jnp.float32)
    h1_ref[...] = h
    st_ref[0:1, 0:1, :] = jnp.sum(h, axis=0, keepdims=True)[None]
    st_ref[0:1, 1:2, :] = jnp.sum(h * h, axis=0, keepdims=True)[None]


# --------------------------------------------------------------------------
# stage 2: bn1-affine + relu, conv2 (3x3, pad=1) via im2col, bn2 partials
# --------------------------------------------------------------------------
def _conv2_kernel(h1_ref, sc1_ref, bs1_ref, w2_ref, h2_ref, st_ref,
                  pad_ref, col_ref):
    # h1_ref: (1, H, W, P) f32   sc1/bs1: (1, P) f32   w2_ref: (9P, P) bf16
    # pad_ref: (H+2, W+2, P) f32 scratch   col_ref: (H*W, 9P) bf16 scratch
    hp2, wp2, p = pad_ref.shape
    h, w = hp2 - 2, wp2 - 2

    # fused bn1 affine + relu (f32)
    a = jnp.maximum(h1_ref[0] * sc1_ref[...] + bs1_ref[...], 0.0)   # (H, W, P)

    # true 2D zero padding: zero only the halo border (interior is fully
    # overwritten each step, so this is megacore-safe and avoids a full fill)
    zrow = jnp.zeros((1, wp2, p), jnp.float32)
    zcol = jnp.zeros((hp2, 1, p), jnp.float32)
    pad_ref[0:1, :, :] = zrow
    pad_ref[h + 1:h + 2, :, :] = zrow
    pad_ref[:, 0:1, :] = zcol
    pad_ref[:, w + 1:w + 2, :] = zcol
    pad_ref[1:h + 1, 1:w + 1, :] = a

    # im2col: 9 shifted taps laid out lane-contiguously -> one K=9P matmul
    for t in range(9):
        di, dj = divmod(t, 3)
        tap = pad_ref[di:di + h, dj:dj + w, :].reshape(h * w, p)
        col_ref[:, t * p:(t + 1) * p] = tap.astype(col_ref.dtype)

    h2 = jnp.dot(col_ref[...], w2_ref[...], preferred_element_type=jnp.float32)
    h2_ref[...] = h2.reshape(1, h, w, p)
    st_ref[0:1, 0:1, :] = jnp.sum(h2, axis=0, keepdims=True)[None]
    st_ref[0:1, 1:2, :] = jnp.sum(h2 * h2, axis=0, keepdims=True)[None]


# --------------------------------------------------------------------------
# stage 3: bn2-affine + relu, conv3 (1x1), bn3 partial statistics
# --------------------------------------------------------------------------
def _conv3_kernel(h2_ref, sc2_ref, bs2_ref, w3_ref, h3_ref, st_ref):
    a = jnp.maximum(h2_ref[...] * sc2_ref[...] + bs2_ref[...], 0.0)  # (TM, P)
    h = jnp.dot(a.astype(w3_ref.dtype), w3_ref[...],
                preferred_element_type=jnp.float32)                  # (TM, 4P)
    h3_ref[...] = h
    st_ref[0:1, 0:1, :] = jnp.sum(h, axis=0, keepdims=True)[None]
    st_ref[0:1, 1:2, :] = jnp.sum(h * h, axis=0, keepdims=True)[None]


# --------------------------------------------------------------------------
# stage 4: bn3-affine + identity residual + relu
# --------------------------------------------------------------------------
def _out_kernel(h3_ref, sc3_ref, bs3_ref, res_ref, out_ref):
    out_ref[...] = jnp.maximum(
        h3_ref[...] * sc3_ref[...] + bs3_ref[...] + res_ref[...], 0.0)


# --------------------------------------------------------------------------
# wrapper
# --------------------------------------------------------------------------
def bottleneck_forward(x_nchw, params, *, tile_rows=2048):
    w1, g1, b1, w2, g2, b2, w3, g3, b3 = params
    N, Cin, H, W = x_nchw.shape
    P = w1.shape[1]
    Cout = w3.shape[1]
    assert Cin == Cout, "identity residual requires inplanes == planes * 4"
    M = N * H * W
    TM = _pick_tile(M, tile_rows)
    n_tiles = M // TM
    cp = _compiler_params()

    # layout glue: NCHW -> NHWC -> (M, C)
    x_f32 = jnp.transpose(x_nchw, (0, 2, 3, 1)).reshape(M, Cin)
    x_f32 = x_f32.astype(jnp.float32)
    x_bf16 = x_f32.astype(jnp.bfloat16)
    w1b = w1.astype(jnp.bfloat16)            # (Cin, P)
    w2b = w2.astype(jnp.bfloat16)            # (9P, P) tap-major
    w3b = w3.astype(jnp.bfloat16)            # (P, 4P)

    # ---- stage 1: conv1 + bn1 partials (tiled over M) ----
    h1, st1 = pl.pallas_call(
        _conv1_kernel,
        grid=(n_tiles,),
        in_specs=[
            pl.BlockSpec((TM, Cin), lambda i: (i, 0)),
            pl.BlockSpec((Cin, P), lambda i: (0, 0)),
        ],
        out_specs=[
            pl.BlockSpec((TM, P), lambda i: (i, 0)),
            pl.BlockSpec((1, 2, P), lambda i: (i, 0, 0)),
        ],
        out_shape=[
            jax.ShapeDtypeStruct((M, P), jnp.float32),
            jax.ShapeDtypeStruct((n_tiles, 2, P), jnp.float32),
        ],
        compiler_params=cp,
    )(x_bf16, w1b)
    sc1, bs1 = _fold_bn(st1, g1, b1, M)

    # ---- stage 2: bn1+relu, conv2 via im2col, bn2 partials (per image) ----
    h1_4d = h1.reshape(N, H, W, P)
    h2_4d, st2 = pl.pallas_call(
        _conv2_kernel,
        grid=(N,),
        in_specs=[
            pl.BlockSpec((1, H, W, P), lambda n: (n, 0, 0, 0)),
            pl.BlockSpec((1, P), lambda n: (0, 0)),
            pl.BlockSpec((1, P), lambda n: (0, 0)),
            pl.BlockSpec((9 * P, P), lambda n: (0, 0)),
        ],
        out_specs=[
            pl.BlockSpec((1, H, W, P), lambda n: (n, 0, 0, 0)),
            pl.BlockSpec((1, 2, P), lambda n: (n, 0, 0)),
        ],
        out_shape=[
            jax.ShapeDtypeStruct((N, H, W, P), jnp.float32),
            jax.ShapeDtypeStruct((N, 2, P), jnp.float32),
        ],
        scratch_shapes=[
            pltpu.VMEM((H + 2, W + 2, P), jnp.float32),
            pltpu.VMEM((H * W, 9 * P), jnp.bfloat16),
        ],
        compiler_params=cp,
    )(h1_4d, sc1, bs1, w2b)
    sc2, bs2 = _fold_bn(st2, g2, b2, M)

    # ---- stage 3: bn2+relu, conv3, bn3 partials (tiled over M) ----
    h2 = h2_4d.reshape(M, P)
    h3, st3 = pl.pallas_call(
        _conv3_kernel,
        grid=(n_tiles,),
        in_specs=[
            pl.BlockSpec((TM, P), lambda i: (i, 0)),
            pl.BlockSpec((1, P), lambda i: (0, 0)),
            pl.BlockSpec((1, P), lambda i: (0, 0)),
            pl.BlockSpec((P, Cout), lambda i: (0, 0)),
        ],
        out_specs=[
            pl.BlockSpec((TM, Cout), lambda i: (i, 0)),
            pl.BlockSpec((1, 2, Cout), lambda i: (i, 0, 0)),
        ],
        out_shape=[
            jax.ShapeDtypeStruct((M, Cout), jnp.float32),
            jax.ShapeDtypeStruct((n_tiles, 2, Cout), jnp.float32),
        ],
        compiler_params=cp,
    )(h2, sc2, bs2, w3b)
    sc3, bs3 = _fold_bn(st3, g3, b3, M)

    # ---- stage 4: bn3 affine + identity residual + relu (tiled over M) ----
    out2d = pl.pallas_call(
        _out_kernel,
        grid=(n_tiles,),
        in_specs=[
            pl.BlockSpec((TM, Cout), lambda i: (i, 0)),
            pl.BlockSpec((1, Cout), lambda i: (0, 0)),
            pl.BlockSpec((1, Cout), lambda i: (0, 0)),
            pl.BlockSpec((TM, Cout), lambda i: (i, 0)),
        ],
        out_specs=pl.BlockSpec((TM, Cout), lambda i: (i, 0)),
        out_shape=jax.ShapeDtypeStruct((M, Cout), jnp.float32),
        compiler_params=cp,
    )(h3, sc3, bs3, x_f32)

    return jnp.transpose(out2d.reshape(N, H, W, Cout), (0, 3, 1, 2))


# --------------------------------------------------------------------------
# parameters (PyTorch shapes -> matmul-friendly layouts)
# --------------------------------------------------------------------------
def init_params(key, inplanes, planes):
    k1, k2, k3 = jax.random.split(key, 3)
    w1_oihw = jax.random.normal(k1, (planes, inplanes, 1, 1), jnp.float32) * 0.1
    w2_oihw = jax.random.normal(k2, (planes, planes, 3, 3), jnp.float32) * 0.1
    w3_oihw = jax.random.normal(k3, (4 * planes, planes, 1, 1), jnp.float32) * 0.1

    w1 = jnp.transpose(w1_oihw[:, :, 0, 0], (1, 0))                 # (Cin, P)
    # OIHW -> HWIO -> (9*I, O): tap-major rows match the im2col slab layout.
    w2 = jnp.transpose(w2_oihw, (2, 3, 1, 0)).reshape(9 * planes, planes)
    w3 = jnp.transpose(w3_oihw[:, :, 0, 0], (1, 0))                 # (P, 4P)

    g1 = jnp.ones((1, planes), jnp.float32)
    b1 = jnp.zeros((1, planes), jnp.float32)
    g2 = jnp.ones((1, planes), jnp.float32)
    b2 = jnp.zeros((1, planes), jnp.float32)
    g3 = jnp.ones((1, 4 * planes), jnp.float32)
    b3 = jnp.zeros((1, 4 * planes), jnp.float32)
    return (w1, g1, b1, w2, g2, b2, w3, g3, b3)


# --------------------------------------------------------------------------
# pure-JAX reference (same mixed precision: bf16 conv operands, f32 accum/BN)
# --------------------------------------------------------------------------
def reference_forward(x_nchw, params):
    w1, g1, b1, w2, g2, b2, w3, g3, b3 = params
    x = jnp.transpose(x_nchw, (0, 2, 3, 1)).astype(jnp.float32)     # NHWC
    P = w1.shape[1]

    def bn(h, g, b):
        mu = jnp.mean(h, axis=(0, 1, 2), keepdims=True)
        var = jnp.mean((h - mu) ** 2, axis=(0, 1, 2), keepdims=True)
        return (h - mu) / jnp.sqrt(var + BN_EPS) * g.reshape(1, 1, 1, -1) \
            + b.reshape(1, 1, 1, -1)

    dn = ("NHWC", "HWIO", "NHWC")

    def conv(h, w_hwio, pad):
        return lax.conv_general_dilated(
            h.astype(jnp.bfloat16), w_hwio.astype(jnp.bfloat16), (1, 1), pad,
            dimension_numbers=dn, preferred_element_type=jnp.float32)

    h = conv(x, w1.reshape(1, 1, *w1.shape), "VALID")
    h = jax.nn.relu(bn(h, g1, b1))
    h = conv(h, w2.reshape(3, 3, P, P), ((1, 1), (1, 1)))
    h = jax.nn.relu(bn(h, g2, b2))
    h = conv(h, w3.reshape(1, 1, *w3.shape), "VALID")
    h = bn(h, g3, b3)
    out = jax.nn.relu(h + x)
    return jnp.transpose(out, (0, 3, 1, 2))


if __name__ == "__main__":
    key = jax.random.PRNGKey(0)
    kx, kp = jax.random.split(key)

    # Small shapes: planes=8, inplanes=planes*expansion=32 so the identity
    # residual (downsample=None, stride=1) is well-defined.
    planes, inplanes = 8, 32
    N, H, W = 2, 8, 8

    x = jax.random.normal(kx, (N, inplanes, H, W), jnp.float32)   # NCHW like PyTorch
    params = init_params(kp, inplanes, planes)

    # tile_rows=64 -> M=128 is split into 2 tiles, exercising the multi-tile
    # pipelined path and cross-tile BN-statistics accumulation.
    out = bottleneck_forward(x, params, tile_rows=64)
    out = jax.block_until_ready(out)

    assert out.shape == (N, planes * 4, H, W)
    assert bool(jnp.all(jnp.isfinite(out)))

    ref = reference_forward(x, params)
    max_err = float(jnp.max(jnp.abs(out - ref)))
    assert jnp.allclose(out, ref, rtol=2e-2, atol=2e-2), f"max_err={max_err}"

    print("KERNEL_OK")
</pallas_src>

<mosaic_0001>
module attributes {stable_mosaic.version = 11 : i64} {
  func.func @_conv1_kernel(%arg0: i32, %arg1: memref<64x32xbf16, #tpu.memory_space<vmem>>, %arg2: memref<32x8xbf16, #tpu.memory_space<vmem>>, %arg3: memref<64x8xf32, #tpu.memory_space<vmem>>, %arg4: memref<1x2x8xf32, #tpu.memory_space<vmem>>) attributes {dimension_semantics = [#tpu.dimension_semantics<parallel>], iteration_bounds = array<i64: 2>, scalar_prefetch = 0 : i64, scratch_operands = 0 : i64, tpu.core_type = #tpu.core_type<tc>, window_params = [{transform_indices = @transform_0, window_bounds = array<i64: 64, 32>}, {pipeline_mode = #tpu.pipeline_mode<synchronous>, transform_indices = @transform_1, window_bounds = array<i64: 32, 8>}, {transform_indices = @transform_2, window_bounds = array<i64: 64, 8>}, {transform_indices = @transform_3, window_bounds = array<i64: 1, 2, 8>}]} {
    %c0 = arith.constant 0 : index
    %c0_0 = arith.constant 0 : index
    %0 = vector.load %arg1[%c0, %c0_0] : memref<64x32xbf16, #tpu.memory_space<vmem>>, vector<64x32xbf16>
    %c0_1 = arith.constant 0 : index
    %c0_2 = arith.constant 0 : index
    %1 = vector.load %arg2[%c0_1, %c0_2] : memref<32x8xbf16, #tpu.memory_space<vmem>>, vector<32x8xbf16>
    %cst = arith.constant dense<0.000000e+00> : vector<64x8xf32>
    %2 = tpu.matmul %0, %1, %cst {dimension_numbers = #tpu.dot_dimension_numbers<[1], [0], [0], [1], [0, 0, 1, 1], [], []>} : vector<64x32xbf16>, vector<32x8xbf16>, vector<64x8xf32> -> vector<64x8xf32>
    %c0_3 = arith.constant 0 : index
    %c0_4 = arith.constant 0 : index
    %3 = vector.load %arg3[%c0_3, %c0_4] : memref<64x8xf32, #tpu.memory_space<vmem>>, vector<64x8xf32>
    tpu.vector_store %arg3[%c0_3, %c0_4], %2 {strides = array<i32>} : memref<64x8xf32, #tpu.memory_space<vmem>>, vector<64x8xf32>,
    %cst_5 = arith.constant dense<0.000000e+00> : vector<8xf32>
    %4 = vector.multi_reduction <add>, %2, %cst_5 [0] : vector<64x8xf32> to vector<8xf32>
    %5 = vector.shape_cast %4 : vector<8xf32> to vector<1x8xf32>
    %6 = vector.shape_cast %5 : vector<1x8xf32> to vector<1x1x8xf32>
    %c0_6 = arith.constant 0 : index
    %c0_7 = arith.constant 0 : index
    %c0_8 = arith.constant 0 : index
    %7 = vector.load %arg4[%c0_6, %c0_7, %c0_8] : memref<1x2x8xf32, #tpu.memory_space<vmem>>, vector<1x1x8xf32>
    tpu.vector_store %arg4[%c0_6, %c0_7, %c0_8], %6 {strides = array<i32>} : memref<1x2x8xf32, #tpu.memory_space<vmem>>, vector<1x1x8xf32>,
    %8 = arith.mulf %2, %2 : vector<64x8xf32>
    %cst_9 = arith.constant dense<0.000000e+00> : vector<8xf32>
    %9 = vector.multi_reduction <add>, %8, %cst_9 [0] : vector<64x8xf32> to vector<8xf32>
    %10 = vector.shape_cast %9 : vector<8xf32> to vector<1x8xf32>
    %11 = vector.shape_cast %10 : vector<1x8xf32> to vector<1x1x8xf32>
    %c0_10 = arith.constant 0 : index
    %c1 = arith.constant 1 : index
    %c0_11 = arith.constant 0 : index
    %12 = vector.load %arg4[%c0_10, %c1, %c0_11] : memref<1x2x8xf32, #tpu.memory_space<vmem>>, vector<1x1x8xf32>
    tpu.vector_store %arg4[%c0_10, %c1, %c0_11], %11 {strides = array<i32>} : memref<1x2x8xf32, #tpu.memory_space<vmem>>, vector<1x1x8xf32>,
    return
  }
  func.func @transform_0(%arg0: i32) -> (i32, i32) {
    %c0_i32 = arith.constant 0 : i32
    %c0_i32_0 = arith.constant 0 : i32
    return %arg0, %c0_i32 : i32, i32
  }
  func.func @transform_1(%arg0: i32) -> (i32, i32) {
    %c0_i32 = arith.constant 0 : i32
    %c0_i32_0 = arith.constant 0 : i32
    %c0_i32_1 = arith.constant 0 : i32
    return %c0_i32, %c0_i32_0 : i32, i32
  }
  func.func @transform_2(%arg0: i32) -> (i32, i32) {
    %c0_i32 = arith.constant 0 : i32
    %c0_i32_0 = arith.constant 0 : i32
    return %arg0, %c0_i32 : i32, i32
  }
  func.func @transform_3(%arg0: i32) -> (i32, i32, i32) {
    %c0_i32 = arith.constant 0 : i32
    %c0_i32_0 = arith.constant 0 : i32
    %c0_i32_1 = arith.constant 0 : i32
    return %arg0, %c0_i32, %c0_i32_0 : i32, i32, i32
  }
}

</mosaic_0001>

<bundles_post_ra>
// kernel: tpu_custom_call.1
= control target key start
LH: loop header
LB: loop body
LE: loop exit
PB: predicated region body
PF: predicated region fallthrough
CT: control target
= control target key end

     0   :  { %9 = vsyncpa [#allocation3], 0  ;;  %s784_s0 = inlined_call_operand.vmem [shape: bf16[128,32], index: 0, kind: input, shape index: {}]   ;;  %s785_s1 = inlined_call_operand.vmem [shape: bf16[32,8], index: 1, kind: input, shape index: {}]   ;;  %s786_s2 = inlined_call_operand.vmem [shape: f32[128,8], index: 2, kind: output, shape index: {0}]   ;;  %s787_s3 = inlined_call_operand.hbm [shape: f32[2,2,8], index: 3, kind: output, shape index: {1}]  }
   0x1   :  { %11 = vsyncpa [#allocation3 + $0x1], 0  ;;  %s652_s12 = smov 0   ;;  %s654_s13 = smov 0  }
   0x2   :  { %s656_s14 = smov 0   ;;  %s658_s15 = smov 0  }
   0x3 LB: > { %s673_s16 = sadd.s32 4294967295, %s629_s15   ;;  %s477_s17 = sadd.s32 4294967294, %s629_s15   ;;  %s629_s15 = sphi %s658_s15, %s793_s15   ;;  %s625_s14 = sphi %s656_s14, %s792_s14   ;;  %s621_s13 = sphi %s654_s13, %s791_s13   ;;  %s617_s12 = sphi %s652_s12, %s790_s12  }
   0x4   : > { %s677_s18 = sadd.s32 1, %s629_s15   ;;  %s97_s19 = sadd.s32 1, %s625_s14 }
   0x5   : > { %s94_s20 = ssub.s32 %s629_s15, %s677_s18  ;;  %p107_p0 = scmp.ne.s32.totalorder %s625_s14, %s621_s13 }
   0x6   : > { %p95_p1 = scmp.eq.s32.totalorder %s94_s20, 0  ;;  %p108_p2 = scmp.eq.s32.totalorder %s673_s16, 1 }
   0x7   : > { %p113_p3 = scmp.ne.s32.totalorder %s621_s13, %s617_s12  ;;  %p114_p4 = scmp.eq.s32.totalorder %s477_s17, 1 }
   0x8   : > { %s688_s21 = scalar_select %p95_p1, %s625_s14, %s97_s19  }
   0x9   : > { %p690_p5 = por %p108_p2, %p107_p0  ;;  %p694_p6 = por %p114_p4, %p113_p3 }
   0xa   : > { %p480_p7 = scmp.ge.s32.totalorder %s629_s15, 1  ;;  %p144_p8 = scmp.lt.s32.totalorder %s629_s15, 3 }
   0xc   : > { %p145_p9 = pnand %p480_p7, %p144_p8 }
   0xd   : > { %v561_v0 = vld [vmem:[%s785_s1] sm:$0xff] (!%p145_p9)   ;;  %s482_s26 = sshll.u32 (!%p145_p9), %s673_s16, 3  ;;  %v562_v1 = vld [vmem:[%s785_s1 + $0x8] sm:$0xff] (!%p145_p9)   ;;  %vm230_vm0 = vcmask (!%p145_p9), 261120   ;;  %vm308_vm1 = vcmask (!%p145_p9), 64512   ;;  %s170_s10 = sand.u32 (!%p145_p9), 1, %s621_s13  }
   0xe   : > { %148 = sbr.rel (%p145_p9) target bundleno = 284 (0x11c), region = 28  ;;  %p174_p10 = scmp.lt.s32.totalorder (!%p145_p9), %s482_s26, 15  ;;  %506 = vmatprep.subr.bf16.mxu0 (!%p145_p9), %v561_v0  ;;  %518 = vmatprep.subr.bf16.mxu1 (!%p145_p9), %v561_v0  ;;  %vm338_vm2 = vcmask (!%p145_p9), 57344  }
   0xf   : > { %507 = vmatpush3.bf16.msra.mxu0 (!%p145_p9), %v561_v0  ;;  %520 = vmatpush3.bf16.msra.mxu1 (!%p145_p9), %v561_v0  ;;  %s481_s11 = sshll.u32 (!%p145_p9), %s170_s10, 1  ;;  %s497_s17 = sshll.u32 (!%p145_p9), %s673_s16, 5 }
  0x10   : > { %508 = vmatprep.subr.bf16.mxu0 (!%p145_p9), %v562_v1  ;;  %519 = vmatprep.subr.bf16.mxu1 (!%p145_p9), %v562_v1  ;;  %s172_s19 = scalar_lea.vmem (!%p145_p9), [#allocation2], %s481_s11  ;;  %s376_s27 = scalar_lea.sflag (!%p145_p9), [#allocation3], %s170_s10 }
  0x11   : > { %s393_s20 = sshll.u32 (!%p145_p9), %s172_s19, 4  ;;  %s631_s16 = smov (!%p145_p9), [#allocation2]   ;;  %s744_s20 = int_to_ptr.vmem [resolvable:$true] %s393_s20 }
  0x12   : > { %s567_s28 = scalar_lea.vmem (!%p145_p9), %s744_s20, 32 }
  0x13   : > { %509 = vmatpush3.bf16.msra.mxu0 (!%p145_p9), %v562_v1  ;;  %521 = vmatpush3.bf16.msra.mxu1 (!%p145_p9), %v562_v1  ;;  %p568_p11 = scmp.ne.s32.totalorder (!%p145_p9), %s744_s20, %s567_s28 }
  0x15   : > { %s795_s26 = smov (!%p174_p10, %s482_s26), 15  ;;  %p569_p12 = pnand %p568_p11, %p690_p5 }
  0x16   : > { %s483_s29 = sshll.u32 %s795_s26, 2  ;;  %s485_s6 = sshll.u32 %s795_s26, 3 }
  0x17   : > { %s177_s5 = scalar_lea.vmem %s784_s0, %s483_s29  ;;  %s183_s9 = scalar_lea.vmem %s786_s2, %s485_s6 }
  0x18   : > { %v563_v2 = vld [vmem:[%s177_s5] sm:$0xff]   ;;  %v564_v3 = vld [vmem:[%s177_s5 + $0x8] sm:$0xff]   ;;  %v565_v4 = vld [vmem:[%s177_s5 + $0x10] sm:$0xff]   ;;  %s742_s26 = scalar_lea.hbm %s787_s3, %s497_s17  ;;  %p570_p13 = pneg %p569_p12 }
  0x19   : > { %510 = vmatprep.mubr.msk.bf16.mxu0 %vm230_vm0, %v563_v2  ;;  %v566_v5 = vld [vmem:[%s177_s5 + $0x18] sm:$0xff]   ;;  %514 = vmatprep.mubr.msk.bf16.mxu1 %vm230_vm0, %v565_v4  ;;  %s571_s29 = sshll.u32 %s631_s16, 4  ;;  %s572_s29 = int_to_ptr.vmem [resolvable:$false] %s571_s29 }
  0x1a   : > { %511 = vmatmul.mubr.msk.bf16.vlgmr.msra.gmra.mrb[0].mxu0 %vm230_vm0, %v564_v3  ;;  %515 = vmatmul.mubr.msk.bf16.vlgmr.msra.gmra.mrb[0].mxu1 %vm230_vm0, %v566_v5  ;;  %s573_s30 = scalar_lea.vmem %s572_s29, 64  ;;  %p574_p0 = scmp.lt.s32.totalorder %s744_s20, %s572_s29 }
  0x1b   : > { %p575_p1 = scmp.lt.s32.totalorder %s573_s30, %s567_s28 }
  0x1d   : > { %p576_p2 = por %p575_p1, %p574_p0 }
  0x1f   : > { %p577_p3 = pnand %p576_p2, %p570_p13 }
  0xed   : > { %v512_v6 = vpop.f32.mrb[0].mxu0  ;;  %v516_v10 = vpop.f32.mrb[0].mxu1 }
  0xee   : > { %311 = vst.msk [vmem:[%s183_s9 + $0x10] sm:$0xff] %vm308_vm1, %v512_v6  ;;  %v277_v7 = vpop.f32.mrb[1].mxu0  ;;  %315 = vst.msk [vmem:[%s183_s9 + $0x30] sm:$0xff] %vm308_vm1, %v516_v10  ;;  %v293_v12 = vpop.f32.mrb[1].mxu1  ;;  %v342_v13 = vmul.f32 %v512_v6, %v512_v6  ;;  %v320_v18 = vsel %vm308_vm1, %v512_v6, 0.0  ;;  %v346_v37 = vmul.f32 %v516_v10, %v516_v10  ;;  %v328_v41 = vsel %vm308_vm1, %v516_v10, 0.0 }
  0xef   : > { %309 = vst.msk [vmem:[%s183_s9] sm:$0xff] %vm308_vm1, %v277_v7  ;;  %v340_v8 = vmul.f32 %v277_v7, %v277_v7  ;;  %v513_v9 = vpop.f32.mrb[2].mxu0  ;;  %v317_v14 = vsel %vm308_vm1, %v277_v7, 0.0  ;;  %313 = vst.msk [vmem:[%s183_s9 + $0x20] sm:$0xff] %vm308_vm1, %v293_v12  ;;  %v517_v17 = vpop.f32.mrb[2].mxu1  ;;  %v344_v24 = vmul.f32 %v293_v12, %v293_v12  ;;  %v324_v29 = vsel %vm308_vm1, %v293_v12, 0.0 }
  0xf0   : > { %312 = vst.msk [vmem:[%s183_s9 + $0x18] sm:$0xff] %vm308_vm1, %v513_v9  ;;  %v280_v11 = vpop.f32.mrb[3].mxu0  ;;  %316 = vst.msk [vmem:[%s183_s9 + $0x38] sm:$0xff] %vm308_vm1, %v517_v17  ;;  %v296_v20 = vpop.f32.mrb[3].mxu1  ;;  %v343_v22 = vmul.f32 %v513_v9, %v513_v9  ;;  %v351_v27 = vsel %vm308_vm1, %v342_v13, 0.0  ;;  %v322_v28 = vsel %vm308_vm1, %v513_v9, 0.0  ;;  %v347_v42 = vmul.f32 %v517_v17, %v517_v17 }
  0xf1   : > { %310 = vst.msk [vmem:[%s183_s9 + $0x8] sm:$0xff] %vm308_vm1, %v280_v11  ;;  %v318_v15 = vsel %vm308_vm1, %v280_v11, 0.0  ;;  %v341_v16 = vmul.f32 %v280_v11, %v280_v11  ;;  %v348_v21 = vsel %vm308_vm1, %v340_v8, 0.0  ;;  %314 = vst.msk [vmem:[%s183_s9 + $0x28] sm:$0xff] %vm308_vm1, %v296_v20  ;;  %v355_v33 = vsel %vm308_vm1, %v344_v24, 0.0 }
  0xf2   : > { %v319_v19 = vadd.f32 %v318_v15, %v317_v14  ;;  %v353_v32 = vsel %vm308_vm1, %v343_v22, 0.0  ;;  %v345_v34 = vmul.f32 %v296_v20, %v296_v20  ;;  %v326_v38 = vsel %vm308_vm1, %v296_v20, 0.0 }
  0xf3   : > { %v349_v23 = vsel %vm308_vm1, %v341_v16, 0.0  ;;  %v359_v46 = vsel %vm308_vm1, %v346_v37, 0.0  ;;  %v330_v47 = vsel %vm308_vm1, %v517_v17, 0.0  ;;  %v361_v50 = vsel %vm308_vm1, %v347_v42, 0.0 }
  0xf4   : > { %v321_v25 = vadd.f32 %v320_v18, %v319_v19  ;;  %v350_v26 = vadd.f32 %v349_v23, %v348_v21  ;;  %v357_v43 = vsel %vm308_vm1, %v345_v34, 0.0 }
  0xf6   : > { %v352_v30 = vadd.f32 %v351_v27, %v350_v26  ;;  %v323_v31 = vadd.f32 %v322_v28, %v321_v25 }
  0xf8   : > { %v325_v35 = vadd.f32 %v324_v29, %v323_v31  ;;  %v354_v36 = vadd.f32 %v353_v32, %v352_v30 }
  0xfa   : > { %v356_v39 = vadd.f32 %v355_v33, %v354_v36  ;;  %v327_v40 = vadd.f32 %v326_v38, %v325_v35 }
  0xfc   : > { %v329_v44 = vadd.f32 %v328_v41, %v327_v40  ;;  %v358_v45 = vadd.f32 %v357_v43, %v356_v39 }
  0xfe   : > { %v331_v48 = vadd.f32 %v330_v47, %v329_v44  ;;  %v360_v49 = vadd.f32 %v359_v46, %v358_v45 }
 0x100   : > { %v332_v51 = vrot.slane %v331_v48, 4  ;;  %v362_v52 = vadd.f32 %v361_v50, %v360_v49 }
 0x102   : > { %v333_v53 = vadd.f32 %v332_v51, %v331_v48  ;;  %v363_v54 = vrot.slane %v362_v52, 4 }
 0x104   : > { %v334_v55 = vrot.slane %v333_v53, 2  ;;  %v364_v56 = vadd.f32 %v363_v54, %v362_v52 }
 0x106   : > { %v335_v57 = vadd.f32 %v334_v55, %v333_v53  ;;  %v365_v58 = vrot.slane %v364_v56, 2 }
 0x108   : > { %v336_v59 = vrot.slane %v335_v57, 1  ;;  %v366_v60 = vadd.f32 %v365_v58, %v364_v56 }
 0x10a   : > { %v337_v61 = vadd.f32 %v336_v59, %v335_v57  ;;  %v367_v62 = vrot.slane %v366_v60, 1 }
 0x10c   : > { %339 = vst.msk [vmem:[%s172_s19] sm:$0x1] %vm338_vm2, %v337_v61  ;;  %v368_v63 = vadd.f32 %v367_v62, %v366_v60 }
 0x10e   : > { %369 = vst.msk [vmem:[%s172_s19 + $0x1] sm:$0x1] %vm338_vm2, %v368_v63 }
 0x10f   : > { %580 = shalt.err (!%p577_p3)
}
 0x110   : > { %s581_s4 = scalar_lea.hbm %s742_s26, 32  ;;  %s585_s7 = scalar_lea.hbm %s787_s3, 64 }
 0x111   : > { %p582_p4 = scmp.ne.s32.totalorder %s742_s26, %s581_s4  ;;  %p586_p9 = scmp.lt.u32.totalorder %s742_s26, %s787_s3 }
 0x112   : > { %p587_p10 = scmp.lt.u32.totalorder %s585_s7, %s581_s4  ;;  %p589_p12 = scmp.lt.u32.totalorder %s581_s4, %s742_s26 }
 0x113   : > { %p583_p7 = pnand %p582_p4, %p690_p5 }
 0x114   : > { %p588_p11 = por %p587_p10, %p586_p9 }
 0x115   : > { %p584_p8 = pneg %p583_p7 }
 0x116   : > { %p590_p13 = por %p589_p12, %p588_p11 }
 0x118   : > { %p591_p0 = pnand %p590_p13, %p584_p8 }
 0x11a   : > { %594 = shalt.err (!%p591_p0)
}
 0x11b   : > { %522 = dma.vmem_to_hbm [thread:$0]  (%p690_p5), %s744_s20, 32, %s742_s26, %s376_s27  }
 0x11c PF: > { %p528_p1 = scmp.ge.s32.totalorder %s629_s15, 2  ;;  %s413_s10 = sand.u32 1, %s617_s12  }
 0x11d   : > { %s414_s11 = scalar_lea.sflag [#allocation3], %s413_s10 }
 0x11e   : > { %p525_p2 = pnand %p528_p1, %p694_p6 }
 0x120   : > { %612 = dma.done.wait (!%p525_p2), %s414_s11, 32  }
 0x121   : > { %614 = vsyncadd (!%p525_p2), %s414_s11, 4294967264  ;;  %p14_p3 = scmp.ge.s32.totalorder %s677_s18, 4   ;;  %s790_s12 = smov %s621_s13 }
 0x122   : > { %s791_s13 = smov %s625_s14  ;;  %s792_s14 = smov %s688_s21 }
 0x123   : > { %s793_s15 = smov %s677_s18  ;;  %16 = sbr.rel (!%p14_p3) target bundleno = 3 (0x3), region = 75 }
 0x12a   :  { %419 = vsyncpa [#allocation3], 1 }
 0x12b   :  { %421 = vsyncpa [#allocation3 + $0x1], 1 }

</bundles_post_ra>
